<compile_context>
chip_gen: v7x
topology: tpu7x:2x2x1
jax: 0.10.0
libtpu: 0.0.40
codegen_flags: <defaults>
</compile_context>

<pallas_src>
import jax
import jax.numpy as jnp
from jax import lax
from jax.experimental import pallas as pl
from jax.experimental.pallas import tpu as pltpu


def _round_up(a, b):
    return (a + b - 1) // b * b


# ----------------------------- Pallas kernels ------------------------------ #

def _cnn_kernel(x_ref, wc_ref, bc_ref, w1_ref, b1_ref, o_ref):
    """Fused per-patch CNN: relu(relu(X @ Wconv + bc) @ W1^T + b1) for P patches."""
    a = jnp.dot(x_ref[...], wc_ref[...],
                preferred_element_type=jnp.float32) + bc_ref[...]   # (P, 8*HW)
    a = jnp.maximum(a, 0.0).astype(jnp.bfloat16)
    f = jnp.dot(a, w1_ref[...],
                preferred_element_type=jnp.float32) + b1_ref[...]   # (P, 64)
    o_ref[...] = jnp.maximum(f, 0.0).astype(o_ref.dtype)


def _classifier_kernel(f_ref, w2_ref, b2_ref, w3_ref, b3_ref, o_ref):
    """Linear(64k -> 64k) then Linear(64k -> num_classes) on a batch row-tile."""
    # TODO(synk): Dropout(0.25)/Dropout(0.5) are eval-mode identities here
    # (deterministic forward); training masks would need pltpu.prng_seed.
    h = jnp.dot(f_ref[...], w2_ref[...],
                preferred_element_type=jnp.float32) + b2_ref[...]
    o_ref[...] = (jnp.dot(h.astype(w3_ref.dtype), w3_ref[...],
                          preferred_element_type=jnp.float32) + b3_ref[...])


# ------------------------------ host wrapper -------------------------------- #

def patch_classifier_forward(patches, params, *, k, patch_size, num_classes):
    B, kk, C, H, W = patches.shape
    assert kk == k and H == patch_size and W == patch_size
    N = B * k
    HW = H * W
    CHW = C * HW
    F8 = 8 * HW                      # conv-output features per patch

    # ---- weight folding (touches only parameters, never the batch; in a real
    #      deployment this would be cached once per model) ----
    wc, bc = params["conv_w"], params["conv_b"]          # (8, C, 3, 3), (8,)
    w1, b1 = params["fc1_w"], params["fc1_b"]            # (64, 8*HW), (64,)
    w2, b2 = params["fc2_w"], params["fc2_b"]            # (64k, 64k), (64k,)
    w3, b3 = params["fc3_w"], params["fc3_b"]            # (nc, 64k), (nc,)

    # Fold the 3x3 / pad=1 conv into a dense (C*HW, 8*HW) matrix by convolving
    # the identity basis: exact by construction (each entry is one conv weight),
    # column order (co, h, w) matches PyTorch's Flatten / fc1_w layout.
    # TODO(synk): Wconv grows as HW^2 (256 KiB here); for patch_size >~ 16-32
    # tile its contraction dim (band structure) instead of holding it whole.
    eye = jnp.eye(CHW, dtype=jnp.float32).reshape(CHW, C, H, W)
    wconv = lax.conv_general_dilated(
        eye, wc.astype(jnp.float32), window_strides=(1, 1),
        padding=((1, 1), (1, 1)),
        dimension_numbers=("NCHW", "OIHW", "NCHW")).reshape(CHW, F8)
    wconv = wconv.astype(jnp.bfloat16)                                 # (C*HW, 8*HW)
    bconv = jnp.repeat(bc.astype(jnp.float32), HW).reshape(1, F8)      # (1, 8*HW)
    w1t = w1.T.astype(jnp.bfloat16)                                    # (8*HW, 64)
    b1v = b1.reshape(1, 64).astype(jnp.float32)
    w2t = w2.T.astype(jnp.bfloat16)                                    # (64k, 64k)
    b2v = b2.reshape(1, -1).astype(jnp.float32)
    w3t = w3.T.astype(jnp.bfloat16)                                    # (64k, nc)
    b3v = b3.reshape(1, -1).astype(jnp.float32)

    # ---- kernel 1: fused per-patch CNN, P patches (sublane axis) per step ----
    P = min(512, _round_up(N, 8))
    N_pad = _round_up(N, P)
    xf = patches.reshape(N, CHW).astype(jnp.bfloat16)                  # (N, C*HW)
    if N_pad > N:
        xf = jnp.pad(xf, ((0, N_pad - N), (0, 0)))

    feats_n = pl.pallas_call(
        _cnn_kernel,
        out_shape=jax.ShapeDtypeStruct((N_pad, 64), jnp.bfloat16),
        grid=(N_pad // P,),
        in_specs=[
            pl.BlockSpec((P, CHW), lambda g: (g, 0)),
            pl.BlockSpec((CHW, F8), lambda g: (0, 0)),
            pl.BlockSpec((1, F8), lambda g: (0, 0)),
            pl.BlockSpec((F8, 64), lambda g: (0, 0)),
            pl.BlockSpec((1, 64), lambda g: (0, 0)),
        ],
        out_specs=pl.BlockSpec((P, 64), lambda g: (g, 0)),
        compiler_params=pltpu.CompilerParams(dimension_semantics=("parallel",)),
    )(xf, wconv, bconv, w1t, b1v)

    # ---- glue: features.view(B, k*64) == pure row-major reshape (no transpose) --
    feats = feats_n[:N].reshape(B, k * 64)
    Bt = min(128, _round_up(B, 8))
    B_pad = _round_up(B, Bt)
    if B_pad > B:
        feats = jnp.pad(feats, ((0, B_pad - B), (0, 0)))

    # ---- kernel 2: classifier, row-tiled over the batch ----
    # TODO(synk): for very large k additionally tile the (64k, 64k) fc2 weight's
    # K/N dims so it fits v7x's 64 MiB VMEM; bf16 weights halve the footprint.
    out = pl.pallas_call(
        _classifier_kernel,
        out_shape=jax.ShapeDtypeStruct((B_pad, num_classes), jnp.float32),
        grid=(B_pad // Bt,),
        in_specs=[
            pl.BlockSpec((Bt, 64 * k), lambda g: (g, 0)),
            pl.BlockSpec((64 * k, 64 * k), lambda g: (0, 0)),
            pl.BlockSpec((1, 64 * k), lambda g: (0, 0)),
            pl.BlockSpec((64 * k, num_classes), lambda g: (0, 0)),
            pl.BlockSpec((1, num_classes), lambda g: (0, 0)),
        ],
        out_specs=pl.BlockSpec((Bt, num_classes), lambda g: (g, 0)),
        compiler_params=pltpu.CompilerParams(dimension_semantics=("parallel",)),
    )(feats, w2t, b2v, w3t, b3v)
    return out[:B]


# ------------------------------ pure-JAX reference -------------------------- #

def reference_forward(patches, params, *, k, num_classes):
    B, kk, C, H, W = patches.shape
    x = patches.reshape(B * kk, C, H, W).astype(jnp.float32)
    conv = lax.conv_general_dilated(
        x, params["conv_w"], window_strides=(1, 1), padding=((1, 1), (1, 1)),
        dimension_numbers=("NCHW", "OIHW", "NCHW"))
    conv = jax.nn.relu(conv + params["conv_b"].reshape(1, 8, 1, 1))
    flat = conv.reshape(B * kk, -1)                        # NCHW flatten (c, h, w)
    f = jax.nn.relu(flat @ params["fc1_w"].T + params["fc1_b"])
    f = f.reshape(B, kk * 64)
    h = f @ params["fc2_w"].T + params["fc2_b"]            # dropout = identity (eval)
    return h @ params["fc3_w"].T + params["fc3_b"]


# ---------------------------------- main ------------------------------------ #

if __name__ == "__main__":
    B, k, C, patch_size, num_classes = 2, 3, 4, 8, 5
    H = W = patch_size
    HW = H * W

    key = jax.random.PRNGKey(0)
    keys = jax.random.split(key, 9)

    params = {
        "conv_w": 0.05 * jax.random.normal(keys[0], (8, C, 3, 3), jnp.float32),
        "conv_b": 0.05 * jax.random.normal(keys[1], (8,), jnp.float32),
        "fc1_w": 0.05 * jax.random.normal(keys[2], (64, 8 * HW), jnp.float32),
        "fc1_b": 0.05 * jax.random.normal(keys[3], (64,), jnp.float32),
        "fc2_w": 0.05 * jax.random.normal(keys[4], (64 * k, 64 * k), jnp.float32),
        "fc2_b": 0.05 * jax.random.normal(keys[5], (64 * k,), jnp.float32),
        "fc3_w": 0.05 * jax.random.normal(keys[6], (num_classes, 64 * k), jnp.float32),
        "fc3_b": 0.05 * jax.random.normal(keys[7], (num_classes,), jnp.float32),
    }
    patches = jax.random.normal(keys[8], (B, k, C, H, W), jnp.float32)

    out = patch_classifier_forward(patches, params, k=k,
                                   patch_size=patch_size, num_classes=num_classes)
    out = jax.block_until_ready(out)

    ref = reference_forward(patches, params, k=k, num_classes=num_classes)
    assert out.shape == (B, num_classes)
    # bf16 operands (f32 accumulation) -> loosened tolerance vs the f32 reference.
    assert jnp.max(jnp.abs(out - ref)) < 2e-2, "Pallas output mismatch vs JAX reference"

    print("KERNEL_OK")
</pallas_src>

<mosaic_0001>
module attributes {stable_mosaic.version = 11 : i64} {
  func.func @_cnn_kernel(%arg0: i32, %arg1: memref<8x256xbf16, #tpu.memory_space<vmem>>, %arg2: memref<256x512xbf16, #tpu.memory_space<vmem>>, %arg3: memref<1x512xf32, #tpu.memory_space<vmem>>, %arg4: memref<512x64xbf16, #tpu.memory_space<vmem>>, %arg5: memref<1x64xf32, #tpu.memory_space<vmem>>, %arg6: memref<8x64xbf16, #tpu.memory_space<vmem>>) attributes {dimension_semantics = [#tpu.dimension_semantics<parallel>], iteration_bounds = array<i64: 1>, scalar_prefetch = 0 : i64, scratch_operands = 0 : i64, tpu.core_type = #tpu.core_type<tc>, window_params = [{transform_indices = @transform_0, window_bounds = array<i64: 8, 256>}, {pipeline_mode = #tpu.pipeline_mode<synchronous>, transform_indices = @transform_1, window_bounds = array<i64: 256, 512>}, {pipeline_mode = #tpu.pipeline_mode<synchronous>, transform_indices = @transform_2, window_bounds = array<i64: 1, 512>}, {pipeline_mode = #tpu.pipeline_mode<synchronous>, transform_indices = @transform_3, window_bounds = array<i64: 512, 64>}, {pipeline_mode = #tpu.pipeline_mode<synchronous>, transform_indices = @transform_4, window_bounds = array<i64: 1, 64>}, {transform_indices = @transform_5, window_bounds = array<i64: 8, 64>}]} {
    %c0 = arith.constant 0 : index
    %c0_0 = arith.constant 0 : index
    %0 = vector.load %arg1[%c0, %c0_0] : memref<8x256xbf16, #tpu.memory_space<vmem>>, vector<8x256xbf16>
    %c0_1 = arith.constant 0 : index
    %c0_2 = arith.constant 0 : index
    %1 = vector.load %arg2[%c0_1, %c0_2] : memref<256x512xbf16, #tpu.memory_space<vmem>>, vector<256x512xbf16>
    %cst = arith.constant dense<0.000000e+00> : vector<8x512xf32>
    %2 = tpu.matmul %0, %1, %cst {dimension_numbers = #tpu.dot_dimension_numbers<[1], [0], [0], [1], [0, 0, 1, 1], [], []>} : vector<8x256xbf16>, vector<256x512xbf16>, vector<8x512xf32> -> vector<8x512xf32>
    %c0_3 = arith.constant 0 : index
    %c0_4 = arith.constant 0 : index
    %3 = vector.load %arg3[%c0_3, %c0_4] : memref<1x512xf32, #tpu.memory_space<vmem>>, vector<1x512xf32>
    %4 = vector.broadcast %3 : vector<1x512xf32> to vector<8x512xf32>
    %5 = arith.addf %2, %4 : vector<8x512xf32>
    %cst_5 = arith.constant 0.000000e+00 : f32
    %6 = vector.broadcast %cst_5 : f32 to vector<8x512xf32>
    %7 = arith.maximumf %5, %6 : vector<8x512xf32>
    %8 = arith.truncf %7 : vector<8x512xf32> to vector<8x512xbf16>
    %c0_6 = arith.constant 0 : index
    %c0_7 = arith.constant 0 : index
    %9 = vector.load %arg4[%c0_6, %c0_7] : memref<512x64xbf16, #tpu.memory_space<vmem>>, vector<512x64xbf16>
    %cst_8 = arith.constant dense<0.000000e+00> : vector<8x64xf32>
    %10 = tpu.matmul %8, %9, %cst_8 {dimension_numbers = #tpu.dot_dimension_numbers<[1], [0], [0], [1], [0, 0, 1, 1], [], []>} : vector<8x512xbf16>, vector<512x64xbf16>, vector<8x64xf32> -> vector<8x64xf32>
    %c0_9 = arith.constant 0 : index
    %c0_10 = arith.constant 0 : index
    %11 = vector.load %arg5[%c0_9, %c0_10] : memref<1x64xf32, #tpu.memory_space<vmem>>, vector<1x64xf32>
    %12 = vector.broadcast %11 : vector<1x64xf32> to vector<8x64xf32>
    %13 = arith.addf %10, %12 : vector<8x64xf32>
    %cst_11 = arith.constant 0.000000e+00 : f32
    %14 = vector.broadcast %cst_11 : f32 to vector<8x64xf32>
    %15 = arith.maximumf %13, %14 : vector<8x64xf32>
    %16 = arith.truncf %15 : vector<8x64xf32> to vector<8x64xbf16>
    %c0_12 = arith.constant 0 : index
    %c0_13 = arith.constant 0 : index
    %17 = vector.load %arg6[%c0_12, %c0_13] : memref<8x64xbf16, #tpu.memory_space<vmem>>, vector<8x64xbf16>
    tpu.vector_store %arg6[%c0_12, %c0_13], %16 {strides = array<i32>} : memref<8x64xbf16, #tpu.memory_space<vmem>>, vector<8x64xbf16>,
    return
  }
  func.func @transform_0(%arg0: i32) -> (i32, i32) {
    %c0_i32 = arith.constant 0 : i32
    %c0_i32_0 = arith.constant 0 : i32
    return %arg0, %c0_i32 : i32, i32
  }
  func.func @transform_1(%arg0: i32) -> (i32, i32) {
    %c0_i32 = arith.constant 0 : i32
    %c0_i32_0 = arith.constant 0 : i32
    %c0_i32_1 = arith.constant 0 : i32
    return %c0_i32, %c0_i32_0 : i32, i32
  }
  func.func @transform_2(%arg0: i32) -> (i32, i32) {
    %c0_i32 = arith.constant 0 : i32
    %c0_i32_0 = arith.constant 0 : i32
    %c0_i32_1 = arith.constant 0 : i32
    return %c0_i32, %c0_i32_0 : i32, i32
  }
  func.func @transform_3(%arg0: i32) -> (i32, i32) {
    %c0_i32 = arith.constant 0 : i32
    %c0_i32_0 = arith.constant 0 : i32
    %c0_i32_1 = arith.constant 0 : i32
    return %c0_i32, %c0_i32_0 : i32, i32
  }
  func.func @transform_4(%arg0: i32) -> (i32, i32) {
    %c0_i32 = arith.constant 0 : i32
    %c0_i32_0 = arith.constant 0 : i32
    %c0_i32_1 = arith.constant 0 : i32
    return %c0_i32, %c0_i32_0 : i32, i32
  }
  func.func @transform_5(%arg0: i32) -> (i32, i32) {
    %c0_i32 = arith.constant 0 : i32
    %c0_i32_0 = arith.constant 0 : i32
    return %arg0, %c0_i32 : i32, i32
  }
}

</mosaic_0001>

<bundles_post_ra>
// kernel: tpu_custom_call.1
= control target key start
LH: loop header
LB: loop body
LE: loop exit
PB: predicated region body
PF: predicated region fallthrough
CT: control target
= control target key end

     0   :  { %10 = vsyncpa [#allocation3], 0  ;;  %s1390_s0 = inlined_call_operand.vmem [shape: bf16[8,256], index: 0, kind: input, shape index: {}]   ;;  %s1391_s1 = inlined_call_operand.hbm [shape: bf16[256,512], index: 1, kind: input, shape index: {}]   ;;  %s1392_s2 = inlined_call_operand.vmem [shape: f32[1,512], index: 2, kind: input, shape index: {}]   ;;  %s1393_s3 = inlined_call_operand.vmem [shape: bf16[512,64], index: 3, kind: input, shape index: {}]   ;;  %s1394_s4 = inlined_call_operand.vmem [shape: f32[1,64], index: 4, kind: input, shape index: {}]   ;;  %s1395_s5 = inlined_call_operand.hbm [shape: bf16[8,64], index: 5, kind: output, shape index: {}]  }
   0x1   :  { %11 = vsyncpa [#allocation4], 0  ;;  %s1227_s18 = smov [#allocation2]   ;;  %s1179_s22 = scalar_lea.hbm %s1391_s1, 8192 }
   0x2   :  { %s19_s19 = sshll.u32 %s1227_s18, 4  ;;  %p1180_p0 = scmp.ne.s32.totalorder %s1391_s1, %s1179_s22  ;;  %s20_s19 = int_to_ptr.vmem [resolvable:$true] %s19_s19 }
   0x3   :  { %p1183_p1 = scmp.lt.u32.totalorder %s1179_s22, %s1391_s1 }
   0x5   :  { %p1185_p2 = pnand %p1183_p1, %p1180_p0 }
   0x7   :  { %1188 = shalt.err (!%p1185_p2)
}
   0x8   :  { %s1189_s27 = scalar_lea.vmem %s20_s19, 8192  ;;  %p1194_p4 = scmp.lt.s32.totalorder %s20_s19, %s20_s19 }
   0x9   :  { %p1190_p3 = scmp.ne.s32.totalorder %s20_s19, %s1189_s27  ;;  %p1195_p5 = scmp.lt.s32.totalorder %s1189_s27, %s1189_s27 }
   0xb   :  { %p1196_p6 = por %p1195_p5, %p1194_p4 }
   0xd   :  { %p1197_p7 = pnand %p1196_p6, %p1190_p3 }
   0xf   :  { %1200 = shalt.err (!%p1197_p7)
}
  0x10   :  { %s1228_s28 = smov 256   ;;  %s1229_s29 = smov 16  }
  0x11   :  { %25 = dma.hbm_to_vmem [thread:$0]  %s1391_s1, 8192, %s20_s19, [#allocation3], %s1228_s28, %s1228_s28, %s1229_s29  }
  0x12   :  { %1223 = dma.done.wait [#allocation3], 8192  }
  0x13   :  { %1224 = vsyncadd [#allocation3], 4294959104  ;;  %v1049_v0 = vld [vmem:[#allocation2 + $0x4] ss:$16 sps:$4 sm:$0xff]   ;;  %v1051_v1 = vld [vmem:[#allocation2 + $0xc] ss:$16 sps:$4 sm:$0xff]  }
  0x14   :  { %450 = vmatprep.subr.bf16.mxu0 %v1049_v0  ;;  %v1053_v2 = vld [vmem:[#allocation2] ss:$16 sps:$4 sm:$0xff]   ;;  %v1054_v3 = vld [vmem:[#allocation2 + $0x8] ss:$16 sps:$4 sm:$0xff]   ;;  %491 = vmatprep.subr.bf16.mxu1 %v1051_v1  ;;  %v1055_v4 = vld [vmem:[#allocation2 + $0x24] ss:$16 sps:$4 sm:$0xff]  }
  0x15   :  { %451 = vmatpush1.bf16.msra.mxu0 %v1053_v2  ;;  %492 = vmatpush1.bf16.msra.mxu1 %v1054_v3  ;;  %v1057_v5 = vld [vmem:[#allocation2 + $0x2c] ss:$16 sps:$4 sm:$0xff]   ;;  %v1059_v6 = vld [vmem:[#allocation2 + $0x20] ss:$16 sps:$4 sm:$0xff]   ;;  %v1060_v7 = vld [vmem:[#allocation2 + $0x28] ss:$16 sps:$4 sm:$0xff]  }
  0x16   :  { %452 = vmatprep.subr.bf16.mxu0 %v1055_v4  ;;  %493 = vmatprep.subr.bf16.mxu1 %v1057_v5  ;;  %v1061_v8 = vld [vmem:[#allocation2 + $0x44] ss:$16 sps:$4 sm:$0xff]   ;;  %v1063_v9 = vld [vmem:[#allocation2 + $0x4c] ss:$16 sps:$4 sm:$0xff]   ;;  %v1065_v10 = vld [vmem:[#allocation2 + $0x40] ss:$16 sps:$4 sm:$0xff]  }
  0x17   :  { %v1066_v11 = vld [vmem:[#allocation2 + $0x48] ss:$16 sps:$4 sm:$0xff]   ;;  %v1067_v12 = vld [vmem:[#allocation2 + $0x64] ss:$16 sps:$4 sm:$0xff]   ;;  %v1069_v13 = vld [vmem:[#allocation2 + $0x6c] ss:$16 sps:$4 sm:$0xff]  }
  0x18   :  { %v1071_v14 = vld [vmem:[#allocation2 + $0x60] ss:$16 sps:$4 sm:$0xff]   ;;  %v1072_v15 = vld [vmem:[#allocation2 + $0x68] ss:$16 sps:$4 sm:$0xff]   ;;  %v1073_v16 = vld [vmem:[#allocation2 + $0x84] ss:$16 sps:$4 sm:$0xff]  }
  0x19   :  { %453 = vmatpush1.bf16.msra.mxu0 %v1059_v6  ;;  %494 = vmatpush1.bf16.msra.mxu1 %v1060_v7  ;;  %v1075_v17 = vld [vmem:[#allocation2 + $0x8c] ss:$16 sps:$4 sm:$0xff]   ;;  %v1077_v18 = vld [vmem:[#allocation2 + $0x80] ss:$16 sps:$4 sm:$0xff]   ;;  %v1078_v19 = vld [vmem:[#allocation2 + $0x88] ss:$16 sps:$4 sm:$0xff]  }
  0x1a   :  { %454 = vmatprep.subr.bf16.mxu0 %v1061_v8  ;;  %495 = vmatprep.subr.bf16.mxu1 %v1063_v9  ;;  %v1079_v20 = vld [vmem:[#allocation2 + $0xa4] ss:$16 sps:$4 sm:$0xff]   ;;  %v1081_v21 = vld [vmem:[#allocation2 + $0xac] ss:$16 sps:$4 sm:$0xff]   ;;  %v1083_v22 = vld [vmem:[#allocation2 + $0xa0] ss:$16 sps:$4 sm:$0xff]  }
  0x1b   :  { %v1084_v23 = vld [vmem:[#allocation2 + $0xa8] ss:$16 sps:$4 sm:$0xff]   ;;  %v1085_v24 = vld [vmem:[#allocation2 + $0xc4] ss:$16 sps:$4 sm:$0xff]   ;;  %v1087_v25 = vld [vmem:[#allocation2 + $0xcc] ss:$16 sps:$4 sm:$0xff]  }
  0x1c   :  { %v1089_v26 = vld [vmem:[#allocation2 + $0xc0] ss:$16 sps:$4 sm:$0xff]   ;;  %v1090_v27 = vld [vmem:[#allocation2 + $0xc8] ss:$16 sps:$4 sm:$0xff]   ;;  %v1091_v28 = vld [vmem:[#allocation2 + $0xe4] ss:$16 sps:$4 sm:$0xff]  }
  0x1d   :  { %455 = vmatpush1.bf16.msra.mxu0 %v1065_v10  ;;  %496 = vmatpush1.bf16.msra.mxu1 %v1066_v11  ;;  %v1093_v29 = vld [vmem:[#allocation2 + $0xec] ss:$16 sps:$4 sm:$0xff]   ;;  %v1095_v30 = vld [vmem:[#allocation2 + $0xe0] ss:$16 sps:$4 sm:$0xff]   ;;  %v1096_v31 = vld [vmem:[#allocation2 + $0xe8] ss:$16 sps:$4 sm:$0xff]  }
  0x1e   :  { %456 = vmatprep.subr.bf16.mxu0 %v1067_v12  ;;  %497 = vmatprep.subr.bf16.mxu1 %v1069_v13  ;;  %v1097_v32 = vld [vmem:[#allocation2 + $0x104] ss:$16 sps:$4 sm:$0xff]   ;;  %v1099_v33 = vld [vmem:[#allocation2 + $0x10c] ss:$16 sps:$4 sm:$0xff]   ;;  %v1101_v34 = vld [vmem:[#allocation2 + $0x100] ss:$16 sps:$4 sm:$0xff]  }
  0x1f   :  { %v1102_v35 = vld [vmem:[#allocation2 + $0x108] ss:$16 sps:$4 sm:$0xff]   ;;  %v1103_v36 = vld [vmem:[#allocation2 + $0x124] ss:$16 sps:$4 sm:$0xff]   ;;  %v1105_v37 = vld [vmem:[#allocation2 + $0x12c] ss:$16 sps:$4 sm:$0xff]  }
  0x20   :  { %v1107_v38 = vld [vmem:[#allocation2 + $0x120] ss:$16 sps:$4 sm:$0xff]   ;;  %v1108_v39 = vld [vmem:[#allocation2 + $0x128] ss:$16 sps:$4 sm:$0xff]   ;;  %v1109_v40 = vld [vmem:[#allocation2 + $0x144] ss:$16 sps:$4 sm:$0xff]  }
  0x21   :  { %457 = vmatpush1.bf16.msra.mxu0 %v1071_v14  ;;  %498 = vmatpush1.bf16.msra.mxu1 %v1072_v15  ;;  %v1111_v41 = vld [vmem:[#allocation2 + $0x14c] ss:$16 sps:$4 sm:$0xff]   ;;  %v1113_v42 = vld [vmem:[#allocation2 + $0x140] ss:$16 sps:$4 sm:$0xff]   ;;  %v1114_v43 = vld [vmem:[#allocation2 + $0x148] ss:$16 sps:$4 sm:$0xff]  }
  0x22   :  { %458 = vmatprep.subr.bf16.mxu0 %v1073_v16  ;;  %499 = vmatprep.subr.bf16.mxu1 %v1075_v17  ;;  %v1115_v44 = vld [vmem:[#allocation2 + $0x164] ss:$16 sps:$4 sm:$0xff]   ;;  %v1117_v45 = vld [vmem:[#allocation2 + $0x16c] ss:$16 sps:$4 sm:$0xff]   ;;  %v1119_v46 = vld [vmem:[#allocation2 + $0x160] ss:$16 sps:$4 sm:$0xff]  }
  0x23   :  { %v36_v47 = vld [vmem:[%s1390_s0] sm:$0xff]  ;;  %v1120_v48 = vld [vmem:[#allocation2 + $0x168] ss:$16 sps:$4 sm:$0xff]   ;;  %v1123_v51 = vld [vmem:[#allocation2 + $0x18c] ss:$16 sps:$4 sm:$0xff]   ;;  %s1230_s19 = smov [#allocation5]  }
  0x24   :  { %v903_v49 = vcombine.high %v36_v47, %v36_v47  ;;  %v1121_v50 = vld [vmem:[#allocation2 + $0x184] ss:$16 sps:$4 sm:$0xff]   ;;  %v1125_v52 = vld [vmem:[#allocation2 + $0x180] ss:$16 sps:$4 sm:$0xff]   ;;  %v1126_v53 = vld [vmem:[#allocation2 + $0x188] ss:$16 sps:$4 sm:$0xff]   ;;  %v902_v5 = vcombine.low %v36_v47, %v36_v47 }
  0x25   :  { %459 = vmatpush1.bf16.msra.mxu0 %v1077_v18  ;;  %500 = vmatpush1.bf16.msra.mxu1 %v1078_v19  ;;  %v1127_v54 = vld [vmem:[#allocation2 + $0x1a4] ss:$16 sps:$4 sm:$0xff]   ;;  %v1129_v55 = vld [vmem:[#allocation2 + $0x1ac] ss:$16 sps:$4 sm:$0xff]   ;;  %v1131_v56 = vld [vmem:[#allocation2 + $0x1a0] ss:$16 sps:$4 sm:$0xff]  }
  0x26   :  { %460 = vmatprep.subr.bf16.mxu0 %v1079_v20  ;;  %501 = vmatprep.subr.bf16.mxu1 %v1081_v21  ;;  %v1132_v57 = vld [vmem:[#allocation2 + $0x1a8] ss:$16 sps:$4 sm:$0xff]   ;;  %v1133_v58 = vld [vmem:[#allocation2 + $0x1c4] ss:$16 sps:$4 sm:$0xff]   ;;  %v1135_v59 = vld [vmem:[#allocation2 + $0x1cc] ss:$16 sps:$4 sm:$0xff]  }
  0x27   :  { %482 = vmatprep.mubr.bf16.mxu0 %v903_v49  ;;  %523 = vmatprep.mubr.bf16.mxu1 %v903_v49  ;;  %v1137_v60 = vld [vmem:[#allocation2 + $0x1c0] ss:$16 sps:$4 sm:$0xff]   ;;  %v1138_v61 = vld [vmem:[#allocation2 + $0x1c8] ss:$16 sps:$4 sm:$0xff]   ;;  %v1139_v62 = vld [vmem:[#allocation2 + $0x1e4] ss:$16 sps:$4 sm:$0xff]  }
  0x28   :  { %v1141_v63 = vld [vmem:[#allocation2 + $0x1ec] ss:$16 sps:$4 sm:$0xff]   ;;  %v1143_v0 = vld [vmem:[#allocation2 + $0x1e0] ss:$16 sps:$4 sm:$0xff]   ;;  %v1144_v1 = vld [vmem:[#allocation2 + $0x1e8] ss:$16 sps:$4 sm:$0xff]  }
  0x29   :  { %461 = vmatpush1.bf16.msra.mxu0 %v1083_v22  ;;  %502 = vmatpush1.bf16.msra.mxu1 %v1084_v23  ;;  %v1147_v2 = vld [vmem:[%s1393_s3 + $0x40] sm:$0xff]   ;;  %v1151_v7 = vld [vmem:[%s1393_s3 + $0x48] sm:$0xff]   ;;  %v1155_v11 = vld [vmem:[%s1393_s3 + $0x50] sm:$0xff]   ;;  %s893_s20 = sshll.u32 %s1230_s19, 4  ;;  %vm885_vm0 = vcmask 519168   ;;  %s894_s20 = int_to_ptr.vmem [resolvable:$true] %s893_s20 }
  0x2a   :  { %462 = vmatprep.subr.bf16.mxu0 %v1085_v24  ;;  %503 = vmatprep.subr.bf16.mxu1 %v1087_v25  ;;  %v1148_v3 = vld [vmem:[%s1393_s3 + $0xc0] sm:$0xff]   ;;  %v1152_v8 = vld [vmem:[%s1393_s3 + $0xc8] sm:$0xff]   ;;  %v1156_v12 = vld [vmem:[%s1393_s3 + $0xd0] sm:$0xff]   ;;  %s1201_s21 = scalar_lea.vmem %s894_s20, 64  ;;  %p1206_p9 = scmp.lt.s32.totalorder %s894_s20, %s894_s20 }
  0x2b   :  { %v1149_v4 = vld [vmem:[%s1393_s3] sm:$0xff]   ;;  %v1153_v9 = vld [vmem:[%s1393_s3 + $0x8] sm:$0xff]   ;;  %v1157_v13 = vld [vmem:[%s1393_s3 + $0x10] sm:$0xff]   ;;  %p1202_p8 = scmp.ne.s32.totalorder %s894_s20, %s1201_s21  ;;  %p1207_p10 = scmp.lt.s32.totalorder %s1201_s21, %s1201_s21 }
  0x2c   :  { %v1150_v6 = vld [vmem:[%s1393_s3 + $0x80] sm:$0xff]   ;;  %v1154_v10 = vld [vmem:[%s1393_s3 + $0x88] sm:$0xff]   ;;  %v1158_v14 = vld [vmem:[%s1393_s3 + $0x90] sm:$0xff]  }
  0x2d   :  { %463 = vmatpush1.bf16.msra.mxu0 %v1089_v26  ;;  %504 = vmatpush1.bf16.msra.mxu1 %v1090_v27  ;;  %v1159_v15 = vld [vmem:[%s1393_s3 + $0x58] sm:$0xff]   ;;  %v1163_v19 = vld [vmem:[%s1393_s3 + $0x60] sm:$0xff]   ;;  %v1167_v23 = vld [vmem:[%s1393_s3 + $0x68] sm:$0xff]   ;;  %p1208_p11 = por %p1207_p10, %p1206_p9 }
  0x2e   :  { %464 = vmatprep.subr.bf16.mxu0 %v1091_v28  ;;  %505 = vmatprep.subr.bf16.mxu1 %v1093_v29  ;;  %v1160_v16 = vld [vmem:[%s1393_s3 + $0xd8] sm:$0xff]   ;;  %v1164_v20 = vld [vmem:[%s1393_s3 + $0xe0] sm:$0xff]   ;;  %v1168_v24 = vld [vmem:[%s1393_s3 + $0xe8] sm:$0xff]  }
  0x2f   :  { %v1161_v17 = vld [vmem:[%s1393_s3 + $0x18] sm:$0xff]   ;;  %v1165_v21 = vld [vmem:[%s1393_s3 + $0x20] sm:$0xff]   ;;  %v1169_v25 = vld [vmem:[%s1393_s3 + $0x28] sm:$0xff]   ;;  %p1209_p12 = pnand %p1208_p11, %p1202_p8 }
  0x30   :  { %v1162_v18 = vld [vmem:[%s1393_s3 + $0x98] sm:$0xff]   ;;  %v1166_v22 = vld [vmem:[%s1393_s3 + $0xa0] sm:$0xff]   ;;  %v1170_v26 = vld [vmem:[%s1393_s3 + $0xa8] sm:$0xff]  }
  0x31   :  { %465 = vmatpush1.bf16.msra.mxu0 %v1095_v30  ;;  %506 = vmatpush1.bf16.msra.mxu1 %v1096_v31  ;;  %v1171_v27 = vld [vmem:[%s1393_s3 + $0x70] sm:$0xff]   ;;  %v1175_v31 = vld [vmem:[%s1393_s3 + $0x78] sm:$0xff]  }
  0x32   :  { %466 = vmatprep.subr.bf16.mxu0 %v1097_v32  ;;  %507 = vmatprep.subr.bf16.mxu1 %v1099_v33  ;;  %v1172_v28 = vld [vmem:[%s1393_s3 + $0xf0] sm:$0xff]   ;;  %v1176_v32 = vld [vmem:[%s1393_s3 + $0xf8] sm:$0xff]  }
  0x33   :  { %v1173_v29 = vld [vmem:[%s1393_s3 + $0x30] sm:$0xff]   ;;  %v1177_v33 = vld [vmem:[%s1393_s3 + $0x38] sm:$0xff]  }
  0x34   :  { %v1174_v30 = vld [vmem:[%s1393_s3 + $0xb0] sm:$0xff]  }
  0x35   :  { %467 = vmatpush1.bf16.msra.mxu0 %v1101_v34  ;;  %508 = vmatpush1.bf16.msra.mxu1 %v1102_v35  ;;  %v1178_v34 = vld [vmem:[%s1393_s3 + $0xb8] sm:$0xff]   ;;  %v103_v35 = vlaneseq }
  0x36   :  { %468 = vmatprep.subr.bf16.mxu0 %v1103_v36  ;;  %509 = vmatprep.subr.bf16.mxu1 %v1105_v37 }
  0x37   :  { %v104_v36 = vshrl.u32 %v103_v35, 7 }
  0x39   :  { %469 = vmatpush1.bf16.msra.mxu0 %v1107_v38  ;;  %510 = vmatpush1.bf16.msra.mxu1 %v1108_v39  ;;  %v105_v37 = vsub.s32 0, %v104_v36  ;;  %v113_v38 = vsub.s32 2, %v104_v36  ;;  %v101_v39 = vld [vmem:[%s1392_s2] sm:$0xf] }
  0x3a   :  { %470 = vmatprep.subr.bf16.mxu0 %v1109_v40  ;;  %511 = vmatprep.subr.bf16.mxu1 %v1111_v41  ;;  %v109_v40 = vsub.s32 1, %v104_v36  ;;  %v117_v41 = vsub.s32 3, %v104_v36 }
  0x3d   :  { %471 = vmatpush1.bf16.msra.mxu0 %v1113_v42  ;;  %512 = vmatpush1.bf16.msra.mxu1 %v1114_v43  ;;  %v106_v42 = vrot.slane %v101_v39, %v105_v37  ;;  %v114_v43 = vrot.slane %v101_v39, %v113_v38 }
  0x3e   :  { %472 = vmatprep.subr.bf16.mxu0 %v1115_v44  ;;  %513 = vmatprep.subr.bf16.mxu1 %v1117_v45  ;;  %v110_v44 = vrot.slane %v101_v39, %v109_v40  ;;  %v118_v45 = vrot.slane %v101_v39, %v117_v41 }
  0x41   :  { %473 = vmatpush1.bf16.msra.mxu0 %v1119_v46  ;;  %514 = vmatpush1.bf16.msra.mxu1 %v1120_v48 }
  0x42   :  { %474 = vmatprep.subr.bf16.mxu0 %v1121_v50  ;;  %515 = vmatprep.subr.bf16.mxu1 %v1123_v51 }
  0x45   :  { %475 = vmatpush1.bf16.msra.mxu0 %v1125_v52  ;;  %516 = vmatpush1.bf16.msra.mxu1 %v1126_v53 }
  0x46   :  { %476 = vmatprep.subr.bf16.mxu0 %v1127_v54  ;;  %517 = vmatprep.subr.bf16.mxu1 %v1129_v55 }
  0x49   :  { %477 = vmatpush1.bf16.msra.mxu0 %v1131_v56  ;;  %518 = vmatpush1.bf16.msra.mxu1 %v1132_v57 }
  0x4a   :  { %478 = vmatprep.subr.bf16.mxu0 %v1133_v58  ;;  %519 = vmatprep.subr.bf16.mxu1 %v1135_v59 }
  0x4d   :  { %479 = vmatpush1.bf16.msra.mxu0 %v1137_v60  ;;  %520 = vmatpush1.bf16.msra.mxu1 %v1138_v61 }
  0x4e   :  { %480 = vmatprep.subr.bf16.mxu0 %v1139_v62  ;;  %521 = vmatprep.subr.bf16.mxu1 %v1141_v63 }
  0x51   :  { %481 = vmatpush1.bf16.msra.mxu0 %v1143_v0  ;;  %522 = vmatpush1.bf16.msra.mxu1 %v1144_v1 }
  0x52   :  { %1001 = vmatprep.subr.bf16.mxu0 %v1147_v2  ;;  %1023 = vmatprep.subr.bf16.mxu1 %v1148_v3 }
  0x54   :  { %483 = vmatmul.mubr.bf16.vlgmr.msra.gmra.mrb[0].mxu0 %v902_v5  ;;  %524 = vmatmul.mubr.bf16.vlgmr.msra.gmra.mrb[0].mxu1 %v902_v5 }
  0x55   :  { %1002 = vmatpush3.bf16.msra.mxu0 %v1149_v4  ;;  %1024 = vmatpush3.bf16.msra.mxu1 %v1150_v6  ;;  %v968_v4 = vld [vmem:[%s1394_s4] ss:$0 sm:$0xff] }
  0x56   :  { %1003 = vmatprep.subr.bf16.mxu0 %v1151_v7  ;;  %1025 = vmatprep.subr.bf16.mxu1 %v1152_v8 }
  0x59   :  { %1004 = vmatpush3.bf16.msra.mxu0 %v1153_v9  ;;  %1026 = vmatpush3.bf16.msra.mxu1 %v1154_v10 }
  0x5a   :  { %1005 = vmatprep.subr.bf16.mxu0 %v1155_v11  ;;  %1027 = vmatprep.subr.bf16.mxu1 %v1156_v12 }
  0x5d   :  { %1006 = vmatpush3.bf16.msra.mxu0 %v1157_v13  ;;  %1028 = vmatpush3.bf16.msra.mxu1 %v1158_v14 }
  0x5e   :  { %1007 = vmatprep.subr.bf16.mxu0 %v1159_v15  ;;  %1029 = vmatprep.subr.bf16.mxu1 %v1160_v16 }
  0x61   :  { %1008 = vmatpush3.bf16.msra.mxu0 %v1161_v17  ;;  %1030 = vmatpush3.bf16.msra.mxu1 %v1162_v18 }
  0x62   :  { %1009 = vmatprep.subr.bf16.mxu0 %v1163_v19  ;;  %1031 = vmatprep.subr.bf16.mxu1 %v1164_v20 }
  0x65   :  { %1010 = vmatpush3.bf16.msra.mxu0 %v1165_v21  ;;  %1032 = vmatpush3.bf16.msra.mxu1 %v1166_v22 }
  0x66   :  { %1011 = vmatprep.subr.bf16.mxu0 %v1167_v23  ;;  %1033 = vmatprep.subr.bf16.mxu1 %v1168_v24 }
  0x69   :  { %1012 = vmatpush3.bf16.msra.mxu0 %v1169_v25  ;;  %1034 = vmatpush3.bf16.msra.mxu1 %v1170_v26 }
  0x6a   :  { %1013 = vmatprep.subr.bf16.mxu0 %v1171_v27  ;;  %1035 = vmatprep.subr.bf16.mxu1 %v1172_v28 }
  0x6d   :  { %1014 = vmatpush3.bf16.msra.mxu0 %v1173_v29  ;;  %1036 = vmatpush3.bf16.msra.mxu1 %v1174_v30 }
  0x6e   :  { %1015 = vmatprep.subr.bf16.mxu0 %v1175_v31  ;;  %1037 = vmatprep.subr.bf16.mxu1 %v1176_v32 }
  0x71   :  { %1016 = vmatpush3.bf16.msra.mxu0 %v1177_v33  ;;  %1038 = vmatpush3.bf16.msra.mxu1 %v1178_v34 }
 0x127   :  { %v484_v46 = vpop.f32.mrb[0].mxu0  ;;  %v525_v47 = vpop.f32.mrb[0].mxu1 }
 0x128   :  { %v485_v48 = vadd.f32 %v484_v46, %v106_v42  ;;  %v526_v49 = vadd.f32 %v525_v47, %v114_v43  ;;  %v486_v50 = vpop.f32.mrb[1].mxu0  ;;  %v527_v51 = vpop.f32.mrb[1].mxu1 }
 0x129   :  { %v487_v52 = vadd.f32 %v486_v50, %v110_v44  ;;  %v528_v53 = vadd.f32 %v527_v51, %v118_v45  ;;  %v488_v54 = vpop.f32.mrb[2].mxu0  ;;  %v529_v55 = vpop.f32.mrb[2].mxu1 }
 0x12a   :  { %v532_v56 = vmax.f32 %v485_v48, 0.0  ;;  %v534_v57 = vmax.f32 %v526_v49, 0.0  ;;  %v489_v58 = vpop.f32.mrb[3].mxu0  ;;  %v530_v59 = vpop.f32.mrb[3].mxu1 }
 0x12b   :  { %v533_v60 = vmax.f32 %v487_v52, 0.0  ;;  %v535_v61 = vmax.f32 %v528_v53, 0.0 }
 0x12c   :  { %v538_v62 = vpack.c.bf16 %v534_v57, %v534_v57  ;;  %v536_v1 = vpack.c.bf16 %v532_v56, %v532_v56 }
 0x12d   :  { %v537_v63 = vpack.c.bf16 %v533_v60, %v533_v60  ;;  %v539_v0 = vpack.c.bf16 %v535_v61, %v535_v61 }
 0x12f   :  { %835 = vmatprep.mubr.bf16.mxu0 %v537_v63  ;;  %875 = vmatprep.mubr.bf16.mxu1 %v539_v0 }
 0x130   :  { %836 = vmatmul.mubr.bf16.vlgmr.msra.gmra.mrb[4].mxu0 %v536_v1  ;;  %876 = vmatmul.mubr.bf16.vlgmr.msra.gmra.mrb[4].mxu1 %v538_v62 }
 0x203   :  { %v1017_v2 = vpop.f32.mrb[4].mxu0  ;;  %v1039_v3 = vpop.f32.mrb[4].mxu1 }
 0x204   :  { %v1018_v5 = vpop.f32.mrb[5].mxu0  ;;  %v1040_v6 = vpop.f32.mrb[5].mxu1 }
 0x205   :  { %v1019_v7 = vadd.f32 %v1018_v5, %v1017_v2  ;;  %v1041_v8 = vadd.f32 %v1040_v6, %v1039_v3  ;;  %v1020_v9 = vpop.f32.mrb[6].mxu0  ;;  %v1042_v10 = vpop.f32.mrb[6].mxu1 }
 0x206   :  { %v1021_v11 = vpop.f32.mrb[7].mxu0  ;;  %v1043_v12 = vpop.f32.mrb[7].mxu1 }
 0x207   :  { %v838_v13 = vadd.f32 %v1019_v7, %v968_v4 }
 0x209   :  { %v878_v14 = vadd.f32 %v1041_v8, %v838_v13 }
 0x20b   :  { %v883_v15 = vmax.f32 %v878_v14, 0.0 }
 0x20d   :  { %v884_v16 = vpack.c.bf16 %v883_v15, %v883_v15 }
 0x20f   :  { %886 = vst.msk [vmem:[#allocation5] sm:$0xf] %vm885_vm0, %v884_v16 }
 0x210   :  { %1212 = shalt.err (!%p1209_p12)
}
 0x211   :  { %s1213_s23 = scalar_lea.hbm %s1395_s5, 64 }
 0x212   :  { %p1214_p13 = scmp.ne.s32.totalorder %s1395_s5, %s1213_s23  ;;  %p1217_p0 = scmp.lt.u32.totalorder %s1213_s23, %s1395_s5 }
 0x214   :  { %p1219_p1 = pnand %p1217_p0, %p1214_p13 }
 0x216   :  { %1222 = shalt.err (!%p1219_p1)
}
 0x217   :  { %896 = dma.vmem_to_hbm [thread:$0]  %s894_s20, 64, %s1395_s5, [#allocation4]  }
 0x218   :  { %1225 = dma.done.wait [#allocation4], 64  }
 0x219   :  { %1226 = vsyncadd [#allocation4], 4294967232 }
 0x21a   :  { %900 = vsyncpa [#allocation3], 1 }
 0x21b   :  { %901 = vsyncpa [#allocation4], 1 }

</bundles_post_ra>
